<compile_context>
chip_gen: v7x
topology: tpu7x:2x2x1
jax: 0.10.0
libtpu: 0.0.40
codegen_flags: <defaults>
</compile_context>

<pallas_src>
import functools

import jax
import jax.numpy as jnp
import numpy as np
from jax.experimental import pallas as pl
from jax.experimental.pallas import tpu as pltpu


# Sublane-aligned halo for the padded conv scratch: the interior store at
# offset _HALO stays (8,128)-tile aligned and the halo rows stay zero.
_HALO = 8


# ------------------------------- the kernel --------------------------------

def duration_predictor_kernel(x_ref, mask_ref, cond_ref,
                              w1_ref, b1_ref, g1_ref, be1_ref,
                              w2_ref, b2_ref, g2_ref, be2_ref,
                              wp_ref, bp_ref,
                              out_ref,
                              pad1_ref, pad2_ref,
                              *, K, pad, eps):
    B, T, H = x_ref.shape

    # Zero the padded scratches once; only the interior [_HALO:_HALO+T] is
    # rewritten per conv, the halo rows provide the 'same' zero padding.
    pad1_ref[...] = jnp.zeros_like(pad1_ref)
    pad2_ref[...] = jnp.zeros_like(pad2_ref)

    mask = mask_ref[...].astype(jnp.float32)                      # (B, T, 1)
    # speaker conditioning (precomputed in the wrapper): broadcast add over T
    x = x_ref[...].astype(jnp.float32) + cond_ref[...].astype(jnp.float32)
    x = x * mask                                                  # conv_1 input

    def conv_relu_ln(xm, scratch, w_ref, b_ref, g_ref, be_ref):
        # xm: (B, T, Cin) f32, already masked.
        Cin = xm.shape[-1]
        Cout = w_ref.shape[-1]
        # aligned interior store into the persistent zero-haloed scratch
        scratch[:, _HALO:_HALO + T, :] = xm
        xp = scratch[...]                                         # (B, T+2*_HALO, Cin)
        # Stack the K shifted taps along channels -> one fused MXU matmul
        # with contraction dim K*Cin (bf16 operands, f32 accumulation).
        taps = [xp[:, _HALO - pad + k:_HALO - pad + k + T, :] for k in range(K)]
        xs = jnp.concatenate(taps, axis=-1).reshape(B * T, K * Cin)
        h = jnp.dot(xs.astype(jnp.bfloat16), w_ref[...],
                    preferred_element_type=jnp.float32) + b_ref[...]
        h = jnp.maximum(h, 0.0)                                   # ReLU
        # LayerNorm over channels (f32, biased variance, eps inside sqrt)
        mean = jnp.mean(h, axis=-1, keepdims=True)
        var = jnp.mean((h - mean) ** 2, axis=-1, keepdims=True)
        h = (h - mean) * jax.lax.rsqrt(var + eps)
        h = h * g_ref[...] + be_ref[...]
        return h.reshape(B, T, Cout)

    # conv_1 -> relu -> layernorm   (dropout = identity in eval mode)
    h = conv_relu_ln(x, pad1_ref, w1_ref, b1_ref, g1_ref, be1_ref)
    # conv_2 -> relu -> layernorm
    h = conv_relu_ln(h * mask, pad2_ref, w2_ref, b2_ref, g2_ref, be2_ref)

    # proj (F -> 1): VPU multiply by the wp row + lane reduction instead of a
    # wasteful 1-column MXU matmul; bias and final mask multiply fused in.
    wp = wp_ref[...].reshape(1, 1, -1)                            # (1, 1, F)
    out = jnp.sum(h * mask * wp, axis=-1, keepdims=True) + bp_ref[...]
    out_ref[...] = (out * mask).astype(out_ref.dtype)


# ------------------------------- wrapper ------------------------------------

def vits_duration_predictor(inputs, padding_mask, global_conditioning, params,
                            *, kernel_size, eps):
    """inputs: (B, H, T), padding_mask: (B, 1, T), global_conditioning: (B, S, 1).
    Returns (B, 1, T), matching the PyTorch module (eval mode)."""
    B, H, T = inputs.shape
    K = kernel_size
    assert K % 2 == 1, "padding=K//2 only reproduces PyTorch 'same' conv for odd K"
    pad = K // 2
    assert pad <= _HALO
    F = params["w1"].shape[2]

    # channels-last layout for the kernel (lane dim = channels)
    x_btc = jnp.transpose(inputs, (0, 2, 1))                      # (B, T, H)
    mask_bt1 = jnp.transpose(padding_mask, (0, 2, 1))             # (B, T, 1)

    # Hoisted speaker-conditioning 1x1 conv: one tiny XLA matmul for all B.
    if global_conditioning is not None:
        gc_b1s = jnp.transpose(global_conditioning, (0, 2, 1))    # (B, 1, S)
        cond = jnp.matmul(gc_b1s, params["wc"]) + params["bc"]    # (B, 1, H)
    else:
        cond = jnp.zeros((B, 1, H), jnp.float32)

    # Conv weights pre-reshaped for the fused K-tap matmul, cast to bf16 for
    # the MXU (accumulation stays f32 inside the kernel).
    w1s = params["w1"].reshape(K * H, F).astype(jnp.bfloat16)     # (K*H, F)
    w2s = params["w2"].reshape(K * F, F).astype(jnp.bfloat16)     # (K*F, F)

    kernel = functools.partial(duration_predictor_kernel, K=K, pad=pad, eps=eps)

    out_bt1 = pl.pallas_call(
        kernel,
        out_shape=jax.ShapeDtypeStruct((B, T, 1), jnp.float32),
        # Single gridless invocation: whole (tiny) operands live in VMEM; no
        # per-step grid overhead, no double-buffering of the constant weights.
        in_specs=[pl.BlockSpec(memory_space=pltpu.MemorySpace.VMEM)
                  for _ in range(13)],
        out_specs=pl.BlockSpec(memory_space=pltpu.MemorySpace.VMEM),
        scratch_shapes=[pltpu.VMEM((B, T + 2 * _HALO, H), jnp.float32),
                        pltpu.VMEM((B, T + 2 * _HALO, F), jnp.float32)],
    )(x_btc, mask_bt1, cond,
      w1s, params["b1"], params["g1"], params["be1"],
      w2s, params["b2"], params["g2"], params["be2"],
      params["wp"], params["bp"])

    return jnp.transpose(out_bt1, (0, 2, 1))                      # (B, 1, T)


# --------------------------- pure-JAX reference ------------------------------

def ref_forward(inputs, padding_mask, gc, p, *, kernel_size, eps):
    pad = kernel_size // 2

    def conv1d(x, w_oih, b, padding):
        y = jax.lax.conv_general_dilated(
            x, w_oih, window_strides=(1,), padding=[(padding, padding)],
            dimension_numbers=("NCH", "OIH", "NCH"))
        return y + b[None, :, None]

    def ln(x, g, bta):  # x: (B, C, T), normalize over C (like transpose(1,-1))
        xt = jnp.transpose(x, (0, 2, 1))
        mean = jnp.mean(xt, -1, keepdims=True)
        var = jnp.mean((xt - mean) ** 2, -1, keepdims=True)
        xn = (xt - mean) / jnp.sqrt(var + eps) * g + bta
        return jnp.transpose(xn, (0, 2, 1))

    x = inputs + conv1d(gc, p["wc_oih"], p["bc_flat"], 0)
    x = conv1d(x * padding_mask, p["w1_oih"], p["b1_flat"], pad)
    x = jax.nn.relu(x)
    x = ln(x, p["g1_flat"], p["be1_flat"])
    x = conv1d(x * padding_mask, p["w2_oih"], p["b2_flat"], pad)
    x = jax.nn.relu(x)
    x = ln(x, p["g2_flat"], p["be2_flat"])
    x = conv1d(x * padding_mask, p["wp_oih"], p["bp_flat"], 0)
    return x * padding_mask


# ---------------------------------- main -------------------------------------

if __name__ == "__main__":
    # "config": hidden=32, filter=32, kernel=3, speaker_emb=8, eps=1e-5
    B, H, F, T, K, S = 2, 32, 32, 16, 3, 8
    EPS = 1e-5

    key = jax.random.PRNGKey(0)
    ks = jax.random.split(key, 12)

    # parameters created directly in PyTorch Conv1d / LayerNorm shapes (OIH)
    w1_oih = jax.random.normal(ks[0], (F, H, K), jnp.float32) * 0.1
    b1 = jax.random.normal(ks[1], (F,), jnp.float32) * 0.1
    g1 = jnp.ones((F,), jnp.float32) + 0.05 * jax.random.normal(ks[2], (F,))
    be1 = 0.05 * jax.random.normal(ks[3], (F,))
    w2_oih = jax.random.normal(ks[4], (F, F, K), jnp.float32) * 0.1
    b2 = jax.random.normal(ks[5], (F,), jnp.float32) * 0.1
    g2 = jnp.ones((F,), jnp.float32) + 0.05 * jax.random.normal(ks[6], (F,))
    be2 = 0.05 * jax.random.normal(ks[7], (F,))
    wp_oih = jax.random.normal(ks[8], (1, F, 1), jnp.float32) * 0.1
    bp = jax.random.normal(ks[9], (1,), jnp.float32) * 0.1
    wc_oih = jax.random.normal(ks[10], (H, S, 1), jnp.float32) * 0.1
    bc = jax.random.normal(ks[11], (H,), jnp.float32) * 0.1

    # kernel-layout parameters (channels-last)
    params = {
        "w1": jnp.transpose(w1_oih, (2, 1, 0)),        # (K, H, F)
        "b1": b1[None, :], "g1": g1[None, :], "be1": be1[None, :],
        "w2": jnp.transpose(w2_oih, (2, 1, 0)),        # (K, F, F)
        "b2": b2[None, :], "g2": g2[None, :], "be2": be2[None, :],
        "wp": wp_oih[:, :, 0],                         # (1, F) row for VPU proj
        "bp": bp[None, :],                             # (1, 1)
        "wc": jnp.transpose(wc_oih[:, :, 0], (1, 0)),  # (S, H)
        "bc": bc[None, :],                             # (1, H)
        # reference-layout copies
        "w1_oih": w1_oih, "b1_flat": b1, "g1_flat": g1, "be1_flat": be1,
        "w2_oih": w2_oih, "b2_flat": b2, "g2_flat": g2, "be2_flat": be2,
        "wp_oih": wp_oih, "bp_flat": bp,
        "wc_oih": wc_oih, "bc_flat": bc,
    }

    # example inputs (PyTorch layouts): inputs (B, H, T), mask (B, 1, T), gc (B, S, 1)
    kx, kg = jax.random.split(jax.random.PRNGKey(1))
    inputs = jax.random.normal(kx, (B, H, T), jnp.float32)
    gcond = jax.random.normal(kg, (B, S, 1), jnp.float32)
    lengths = jnp.array([T, 11])
    padding_mask = (jnp.arange(T)[None, None, :] < lengths[:, None, None]).astype(jnp.float32)

    out = vits_duration_predictor(inputs, padding_mask, gcond, params,
                                  kernel_size=K, eps=EPS)
    out = jax.block_until_ready(out)

    ref = ref_forward(inputs, padding_mask, gcond, params, kernel_size=K, eps=EPS)
    ref = jax.block_until_ready(ref)

    assert out.shape == (B, 1, T), out.shape
    # Tolerance is loosened vs. the pure-f32 version because the conv matmuls
    # now use bf16 MXU operands (f32 accumulation); expected drift ~1e-2.
    np.testing.assert_allclose(np.asarray(out), np.asarray(ref), rtol=5e-2, atol=5e-2)
    print("KERNEL_OK")
</pallas_src>

<mosaic_0001>
module attributes {stable_mosaic.version = 11 : i64} {
  func.func @duration_predictor_kernel(%arg0: memref<2x16x32xf32, #tpu.memory_space<vmem>>, %arg1: memref<2x16x1xf32, #tpu.memory_space<vmem>>, %arg2: memref<2x1x32xf32, #tpu.memory_space<vmem>>, %arg3: memref<96x32xbf16, #tpu.memory_space<vmem>>, %arg4: memref<1x32xf32, #tpu.memory_space<vmem>>, %arg5: memref<1x32xf32, #tpu.memory_space<vmem>>, %arg6: memref<1x32xf32, #tpu.memory_space<vmem>>, %arg7: memref<96x32xbf16, #tpu.memory_space<vmem>>, %arg8: memref<1x32xf32, #tpu.memory_space<vmem>>, %arg9: memref<1x32xf32, #tpu.memory_space<vmem>>, %arg10: memref<1x32xf32, #tpu.memory_space<vmem>>, %arg11: memref<1x32xf32, #tpu.memory_space<vmem>>, %arg12: memref<1x1xf32, #tpu.memory_space<vmem>>, %arg13: memref<2x16x1xf32, #tpu.memory_space<vmem>>, %arg14: memref<2x32x32xf32, #tpu.memory_space<vmem>>, %arg15: memref<2x32x32xf32, #tpu.memory_space<vmem>>) attributes {dimension_semantics = [], scalar_prefetch = 0 : i64, scratch_operands = 2 : i64, tpu.core_type = #tpu.core_type<tc>} {
    %cst = arith.constant 0.000000e+00 : f32
    %0 = vector.broadcast %cst : f32 to vector<2x32x32xf32>
    %c0 = arith.constant 0 : index
    %c0_0 = arith.constant 0 : index
    %c0_1 = arith.constant 0 : index
    %1 = vector.load %arg14[%c0, %c0_0, %c0_1] : memref<2x32x32xf32, #tpu.memory_space<vmem>>, vector<2x32x32xf32>
    tpu.vector_store %arg14[%c0, %c0_0, %c0_1], %0 {strides = array<i32>} : memref<2x32x32xf32, #tpu.memory_space<vmem>>, vector<2x32x32xf32>,
    %cst_2 = arith.constant 0.000000e+00 : f32
    %2 = vector.broadcast %cst_2 : f32 to vector<2x32x32xf32>
    %c0_3 = arith.constant 0 : index
    %c0_4 = arith.constant 0 : index
    %c0_5 = arith.constant 0 : index
    %3 = vector.load %arg15[%c0_3, %c0_4, %c0_5] : memref<2x32x32xf32, #tpu.memory_space<vmem>>, vector<2x32x32xf32>
    tpu.vector_store %arg15[%c0_3, %c0_4, %c0_5], %2 {strides = array<i32>} : memref<2x32x32xf32, #tpu.memory_space<vmem>>, vector<2x32x32xf32>,
    %c0_6 = arith.constant 0 : index
    %c0_7 = arith.constant 0 : index
    %c0_8 = arith.constant 0 : index
    %4 = vector.load %arg1[%c0_6, %c0_7, %c0_8] : memref<2x16x1xf32, #tpu.memory_space<vmem>>, vector<2x16x1xf32>
    %c0_9 = arith.constant 0 : index
    %c0_10 = arith.constant 0 : index
    %c0_11 = arith.constant 0 : index
    %5 = vector.load %arg0[%c0_9, %c0_10, %c0_11] : memref<2x16x32xf32, #tpu.memory_space<vmem>>, vector<2x16x32xf32>
    %c0_12 = arith.constant 0 : index
    %c0_13 = arith.constant 0 : index
    %c0_14 = arith.constant 0 : index
    %6 = vector.load %arg2[%c0_12, %c0_13, %c0_14] : memref<2x1x32xf32, #tpu.memory_space<vmem>>, vector<2x1x32xf32>
    %7 = vector.broadcast %6 : vector<2x1x32xf32> to vector<2x16x32xf32>
    %8 = arith.addf %5, %7 : vector<2x16x32xf32>
    %9 = vector.broadcast %4 : vector<2x16x1xf32> to vector<2x16x32xf32>
    %10 = arith.mulf %8, %9 : vector<2x16x32xf32>
    %c0_15 = arith.constant 0 : index
    %c8 = arith.constant 8 : index
    %c0_16 = arith.constant 0 : index
    %11 = vector.load %arg14[%c0_15, %c8, %c0_16] : memref<2x32x32xf32, #tpu.memory_space<vmem>>, vector<2x16x32xf32>
    tpu.vector_store %arg14[%c0_15, %c8, %c0_16], %10 {strides = array<i32>} : memref<2x32x32xf32, #tpu.memory_space<vmem>>, vector<2x16x32xf32>,
    %c0_17 = arith.constant 0 : index
    %c0_18 = arith.constant 0 : index
    %c0_19 = arith.constant 0 : index
    %12 = vector.load %arg14[%c0_17, %c0_18, %c0_19] : memref<2x32x32xf32, #tpu.memory_space<vmem>>, vector<2x32x32xf32>
    %13 = vector.extract_strided_slice %12 {offsets = [0, 7, 0], sizes = [2, 16, 32], strides = [1, 1, 1]} : vector<2x32x32xf32> to vector<2x16x32xf32>
    %14 = vector.extract_strided_slice %12 {offsets = [0, 8, 0], sizes = [2, 16, 32], strides = [1, 1, 1]} : vector<2x32x32xf32> to vector<2x16x32xf32>
    %15 = vector.extract_strided_slice %12 {offsets = [0, 9, 0], sizes = [2, 16, 32], strides = [1, 1, 1]} : vector<2x32x32xf32> to vector<2x16x32xf32>
    %16 = tpu.concatenate %13, %14, %15 in 2 : vector<2x16x32xf32>, vector<2x16x32xf32>, vector<2x16x32xf32> -> vector<2x16x96xf32>
    %17 = vector.shape_cast %16 : vector<2x16x96xf32> to vector<32x96xf32>
    %18 = arith.truncf %17 : vector<32x96xf32> to vector<32x96xbf16>
    %c0_20 = arith.constant 0 : index
    %c0_21 = arith.constant 0 : index
    %19 = vector.load %arg3[%c0_20, %c0_21] : memref<96x32xbf16, #tpu.memory_space<vmem>>, vector<96x32xbf16>
    %cst_22 = arith.constant dense<0.000000e+00> : vector<32x32xf32>
    %20 = tpu.matmul %18, %19, %cst_22 {dimension_numbers = #tpu.dot_dimension_numbers<[1], [0], [0], [1], [0, 0, 1, 1], [], []>} : vector<32x96xbf16>, vector<96x32xbf16>, vector<32x32xf32> -> vector<32x32xf32>
    %c0_23 = arith.constant 0 : index
    %c0_24 = arith.constant 0 : index
    %21 = vector.load %arg4[%c0_23, %c0_24] : memref<1x32xf32, #tpu.memory_space<vmem>>, vector<1x32xf32>
    %22 = vector.broadcast %21 : vector<1x32xf32> to vector<32x32xf32>
    %23 = arith.addf %20, %22 : vector<32x32xf32>
    %cst_25 = arith.constant 0.000000e+00 : f32
    %24 = vector.broadcast %cst_25 : f32 to vector<32x32xf32>
    %25 = arith.maximumf %23, %24 : vector<32x32xf32>
    %cst_26 = arith.constant dense<0.000000e+00> : vector<32xf32>
    %26 = vector.multi_reduction <add>, %25, %cst_26 [1] : vector<32x32xf32> to vector<32xf32>
    %27 = vector.shape_cast %26 : vector<32xf32> to vector<32x1xf32>
    %cst_27 = arith.constant 3.200000e+01 : f32
    %28 = vector.broadcast %cst_27 : f32 to vector<32x1xf32>
    %29 = arith.divf %27, %28 : vector<32x1xf32>
    %30 = vector.broadcast %29 : vector<32x1xf32> to vector<32x32xf32>
    %31 = arith.subf %25, %30 : vector<32x32xf32>
    %32 = arith.mulf %31, %31 : vector<32x32xf32>
    %cst_28 = arith.constant dense<0.000000e+00> : vector<32xf32>
    %33 = vector.multi_reduction <add>, %32, %cst_28 [1] : vector<32x32xf32> to vector<32xf32>
    %34 = vector.shape_cast %33 : vector<32xf32> to vector<32x1xf32>
    %cst_29 = arith.constant 3.200000e+01 : f32
    %35 = vector.broadcast %cst_29 : f32 to vector<32x1xf32>
    %36 = arith.divf %34, %35 : vector<32x1xf32>
    %37 = vector.broadcast %29 : vector<32x1xf32> to vector<32x32xf32>
    %38 = arith.subf %25, %37 : vector<32x32xf32>
    %cst_30 = arith.constant 9.99999974E-6 : f32
    %39 = vector.broadcast %cst_30 : f32 to vector<32x1xf32>
    %40 = arith.addf %36, %39 : vector<32x1xf32>
    %41 = math.rsqrt %40 : vector<32x1xf32>
    %42 = vector.broadcast %41 : vector<32x1xf32> to vector<32x32xf32>
    %43 = arith.mulf %38, %42 : vector<32x32xf32>
    %c0_31 = arith.constant 0 : index
    %c0_32 = arith.constant 0 : index
    %44 = vector.load %arg5[%c0_31, %c0_32] : memref<1x32xf32, #tpu.memory_space<vmem>>, vector<1x32xf32>
    %45 = vector.broadcast %44 : vector<1x32xf32> to vector<32x32xf32>
    %46 = arith.mulf %43, %45 : vector<32x32xf32>
    %c0_33 = arith.constant 0 : index
    %c0_34 = arith.constant 0 : index
    %47 = vector.load %arg6[%c0_33, %c0_34] : memref<1x32xf32, #tpu.memory_space<vmem>>, vector<1x32xf32>
    %48 = vector.broadcast %47 : vector<1x32xf32> to vector<32x32xf32>
    %49 = arith.addf %46, %48 : vector<32x32xf32>
    %50 = vector.shape_cast %49 : vector<32x32xf32> to vector<2x16x32xf32>
    %51 = vector.broadcast %4 : vector<2x16x1xf32> to vector<2x16x32xf32>
    %52 = arith.mulf %50, %51 : vector<2x16x32xf32>
    %c0_35 = arith.constant 0 : index
    %c8_36 = arith.constant 8 : index
    %c0_37 = arith.constant 0 : index
    %53 = vector.load %arg15[%c0_35, %c8_36, %c0_37] : memref<2x32x32xf32, #tpu.memory_space<vmem>>, vector<2x16x32xf32>
    tpu.vector_store %arg15[%c0_35, %c8_36, %c0_37], %52 {strides = array<i32>} : memref<2x32x32xf32, #tpu.memory_space<vmem>>, vector<2x16x32xf32>,
    %c0_38 = arith.constant 0 : index
    %c0_39 = arith.constant 0 : index
    %c0_40 = arith.constant 0 : index
    %54 = vector.load %arg15[%c0_38, %c0_39, %c0_40] : memref<2x32x32xf32, #tpu.memory_space<vmem>>, vector<2x32x32xf32>
    %55 = vector.extract_strided_slice %54 {offsets = [0, 7, 0], sizes = [2, 16, 32], strides = [1, 1, 1]} : vector<2x32x32xf32> to vector<2x16x32xf32>
    %56 = vector.extract_strided_slice %54 {offsets = [0, 8, 0], sizes = [2, 16, 32], strides = [1, 1, 1]} : vector<2x32x32xf32> to vector<2x16x32xf32>
    %57 = vector.extract_strided_slice %54 {offsets = [0, 9, 0], sizes = [2, 16, 32], strides = [1, 1, 1]} : vector<2x32x32xf32> to vector<2x16x32xf32>
    %58 = tpu.concatenate %55, %56, %57 in 2 : vector<2x16x32xf32>, vector<2x16x32xf32>, vector<2x16x32xf32> -> vector<2x16x96xf32>
    %59 = vector.shape_cast %58 : vector<2x16x96xf32> to vector<32x96xf32>
    %60 = arith.truncf %59 : vector<32x96xf32> to vector<32x96xbf16>
    %c0_41 = arith.constant 0 : index
    %c0_42 = arith.constant 0 : index
    %61 = vector.load %arg7[%c0_41, %c0_42] : memref<96x32xbf16, #tpu.memory_space<vmem>>, vector<96x32xbf16>
    %cst_43 = arith.constant dense<0.000000e+00> : vector<32x32xf32>
    %62 = tpu.matmul %60, %61, %cst_43 {dimension_numbers = #tpu.dot_dimension_numbers<[1], [0], [0], [1], [0, 0, 1, 1], [], []>} : vector<32x96xbf16>, vector<96x32xbf16>, vector<32x32xf32> -> vector<32x32xf32>
    %c0_44 = arith.constant 0 : index
    %c0_45 = arith.constant 0 : index
    %63 = vector.load %arg8[%c0_44, %c0_45] : memref<1x32xf32, #tpu.memory_space<vmem>>, vector<1x32xf32>
    %64 = vector.broadcast %63 : vector<1x32xf32> to vector<32x32xf32>
    %65 = arith.addf %62, %64 : vector<32x32xf32>
    %cst_46 = arith.constant 0.000000e+00 : f32
    %66 = vector.broadcast %cst_46 : f32 to vector<32x32xf32>
    %67 = arith.maximumf %65, %66 : vector<32x32xf32>
    %cst_47 = arith.constant dense<0.000000e+00> : vector<32xf32>
    %68 = vector.multi_reduction <add>, %67, %cst_47 [1] : vector<32x32xf32> to vector<32xf32>
    %69 = vector.shape_cast %68 : vector<32xf32> to vector<32x1xf32>
    %cst_48 = arith.constant 3.200000e+01 : f32
    %70 = vector.broadcast %cst_48 : f32 to vector<32x1xf32>
    %71 = arith.divf %69, %70 : vector<32x1xf32>
    %72 = vector.broadcast %71 : vector<32x1xf32> to vector<32x32xf32>
    %73 = arith.subf %67, %72 : vector<32x32xf32>
    %74 = arith.mulf %73, %73 : vector<32x32xf32>
    %cst_49 = arith.constant dense<0.000000e+00> : vector<32xf32>
    %75 = vector.multi_reduction <add>, %74, %cst_49 [1] : vector<32x32xf32> to vector<32xf32>
    %76 = vector.shape_cast %75 : vector<32xf32> to vector<32x1xf32>
    %cst_50 = arith.constant 3.200000e+01 : f32
    %77 = vector.broadcast %cst_50 : f32 to vector<32x1xf32>
    %78 = arith.divf %76, %77 : vector<32x1xf32>
    %79 = vector.broadcast %71 : vector<32x1xf32> to vector<32x32xf32>
    %80 = arith.subf %67, %79 : vector<32x32xf32>
    %cst_51 = arith.constant 9.99999974E-6 : f32
    %81 = vector.broadcast %cst_51 : f32 to vector<32x1xf32>
    %82 = arith.addf %78, %81 : vector<32x1xf32>
    %83 = math.rsqrt %82 : vector<32x1xf32>
    %84 = vector.broadcast %83 : vector<32x1xf32> to vector<32x32xf32>
    %85 = arith.mulf %80, %84 : vector<32x32xf32>
    %c0_52 = arith.constant 0 : index
    %c0_53 = arith.constant 0 : index
    %86 = vector.load %arg9[%c0_52, %c0_53] : memref<1x32xf32, #tpu.memory_space<vmem>>, vector<1x32xf32>
    %87 = vector.broadcast %86 : vector<1x32xf32> to vector<32x32xf32>
    %88 = arith.mulf %85, %87 : vector<32x32xf32>
    %c0_54 = arith.constant 0 : index
    %c0_55 = arith.constant 0 : index
    %89 = vector.load %arg10[%c0_54, %c0_55] : memref<1x32xf32, #tpu.memory_space<vmem>>, vector<1x32xf32>
    %90 = vector.broadcast %89 : vector<1x32xf32> to vector<32x32xf32>
    %91 = arith.addf %88, %90 : vector<32x32xf32>
    %92 = vector.shape_cast %91 : vector<32x32xf32> to vector<2x16x32xf32>
    %c0_56 = arith.constant 0 : index
    %c0_57 = arith.constant 0 : index
    %93 = vector.load %arg11[%c0_56, %c0_57] : memref<1x32xf32, #tpu.memory_space<vmem>>, vector<1x32xf32>
    %94 = vector.shape_cast %93 : vector<1x32xf32> to vector<1x1x32xf32>
    %95 = vector.broadcast %4 : vector<2x16x1xf32> to vector<2x16x32xf32>
    %96 = arith.mulf %92, %95 : vector<2x16x32xf32>
    %97 = vector.broadcast %94 : vector<1x1x32xf32> to vector<2x16x32xf32>
    %98 = arith.mulf %96, %97 : vector<2x16x32xf32>
    %cst_58 = arith.constant dense<0.000000e+00> : vector<2x16xf32>
    %99 = vector.multi_reduction <add>, %98, %cst_58 [2] : vector<2x16x32xf32> to vector<2x16xf32>
    %100 = vector.shape_cast %99 : vector<2x16xf32> to vector<2x16x1xf32>
    %c0_59 = arith.constant 0 : index
    %c0_60 = arith.constant 0 : index
    %101 = vector.load %arg12[%c0_59, %c0_60] : memref<1x1xf32, #tpu.memory_space<vmem>>, vector<1x1xf32>
    %102 = vector.shape_cast %101 : vector<1x1xf32> to vector<1x1x1xf32>
    %103 = vector.broadcast %102 : vector<1x1x1xf32> to vector<2x16x1xf32>
    %104 = arith.addf %100, %103 : vector<2x16x1xf32>
    %105 = arith.mulf %104, %4 : vector<2x16x1xf32>
    %c0_61 = arith.constant 0 : index
    %c0_62 = arith.constant 0 : index
    %c0_63 = arith.constant 0 : index
    %106 = vector.load %arg13[%c0_61, %c0_62, %c0_63] : memref<2x16x1xf32, #tpu.memory_space<vmem>>, vector<2x16x1xf32>
    tpu.vector_store %arg13[%c0_61, %c0_62, %c0_63], %105 {strides = array<i32>} : memref<2x16x1xf32, #tpu.memory_space<vmem>>, vector<2x16x1xf32>,
    return
  }
}

</mosaic_0001>

<bundles_post_ra>
// kernel: tpu_custom_call.1
= control target key start
LH: loop header
LB: loop body
LE: loop exit
PB: predicated region body
PF: predicated region fallthrough
CT: control target
= control target key end

     0   :  { %vm47_vm0 = vcmask 261120   ;;  %v927_v0 = vmov 0   ;;  %v928_v3 = vmov 0.0   ;;  %vm130_vm1 = vcmask 1046528   ;;  %s929_s20 = smov 32   ;;  %s930_s21 = smov 64   ;;  %s1268_s1 = inlined_call_operand.vmem [shape: f32[2,16,1], index: 1, kind: input, shape index: {}]   ;;  %s1269_s3 = inlined_call_operand.vmem [shape: bf16[96,32], index: 3, kind: input, shape index: {}]   ;;  %s1270_s2 = inlined_call_operand.vmem [shape: f32[2,1,32], index: 2, kind: input, shape index: {}]   ;;  %s1271_s0 = inlined_call_operand.vmem [shape: f32[2,16,32], index: 0, kind: input, shape index: {}]   ;;  %s1272_s4 = inlined_call_operand.vmem [shape: f32[1,32], index: 4, kind: input, shape index: {}]   ;;  %s1273_s5 = inlined_call_operand.vmem [shape: f32[1,32], index: 5, kind: input, shape index: {}]   ;;  %s1274_s6 = inlined_call_operand.vmem [shape: f32[1,32], index: 6, kind: input, shape index: {}]   ;;  %s1275_s7 = inlined_call_operand.vmem [shape: bf16[96,32], index: 7, kind: input, shape index: {}]   ;;  %s1276_s8 = inlined_call_operand.vmem [shape: f32[1,32], index: 8, kind: input, shape index: {}]   ;;  %s1277_s12 = inlined_call_operand.<no memory space> [shape: f32[1,1], index: 12, kind: input, shape index: {}]   ;;  %s1278_s9 = inlined_call_operand.vmem [shape: f32[1,32], index: 9, kind: input, shape index: {}]   ;;  %s1279_s10 = inlined_call_operand.vmem [shape: f32[1,32], index: 10, kind: input, shape index: {}]   ;;  %s1280_s11 = inlined_call_operand.vmem [shape: f32[1,32], index: 11, kind: input, shape index: {}]   ;;  %s1281_s13 = inlined_call_operand.vmem [shape: f32[2,16,1], index: 13, kind: output, shape index: {}]  }
   0x1   :  { %838 = vset.pattern.permute.xlu1 %v927_v0  ;;  %837 = vset.pattern.permute.xlu0 %v927_v0  ;;  %v1004_v1 = vld [vmem:[%s1268_s1 + $0x10] sm:$0xff]  ;;  %v1009_v2 = vld [vmem:[%s1268_s1] sm:$0xff]  ;;  %53 = vst.msk [vmem:[#allocation2 + $0x28] sm:$0xff] %vm47_vm0, %v928_v3  ;;  %48 = vst.msk [vmem:[#allocation2] sm:$0xff] %vm47_vm0, %v928_v3  ;;  %vm157_vm2 = vcmask 1045504   ;;  %vm192_vm3 = vcmask 523264  }
   0x2   :  { %49 = vst.msk [vmem:[#allocation2 + $0x8] sm:$0xff] %vm47_vm0, %v928_v3  ;;  %50 = vst.msk [vmem:[#allocation2 + $0x10] sm:$0xff] %vm47_vm0, %v928_v3  ;;  %102 = vperm.xlu1 %838, %v1004_v1   ;;  %92 = vperm.xlu0 %837, %v1009_v2   ;;  %v1032_v4 = vld [vmem:[%s1268_s1 + $0x18] sm:$0xff]  ;;  %v1037_v5 = vld [vmem:[%s1268_s1 + $0x8] sm:$0xff]  ;;  %vm205_vm4 = vcmask 1040384   ;;  %vm277_vm5 = vcmask 785408  }
   0x3   :  { %51 = vst.msk [vmem:[#allocation2 + $0x18] sm:$0xff] %vm47_vm0, %v928_v3  ;;  %52 = vst.msk [vmem:[#allocation2 + $0x20] sm:$0xff] %vm47_vm0, %v928_v3  ;;  %v899_v6 = vld [vmem:[%s1269_s3] sm:$0xff]   ;;  %v900_v7 = vld [vmem:[%s1269_s3 + $0x8] sm:$0xff]   ;;  %vm750_vm6 = vcmask 7168  }
   0x4   :  { %54 = vst.msk [vmem:[#allocation2 + $0x30] sm:$0xff] %vm47_vm0, %v928_v3  ;;  %55 = vst.msk [vmem:[#allocation2 + $0x38] sm:$0xff] %vm47_vm0, %v928_v3  ;;  %801 = vmatprep.subr.bf16.mxu0 %v899_v6  ;;  %v760_v8 = vld [vmem:[%s1270_s2 + $0x1] ss:$0 sm:$0xff]  ;;  %v70_v9 = vld [vmem:[%s1271_s0 + $0x10] sm:$0xff] }
   0x5   :  { %56 = vst.msk [vmem:[#allocation3] sm:$0xff] %vm47_vm0, %v928_v3  ;;  %57 = vst.msk [vmem:[#allocation3 + $0x8] sm:$0xff] %vm47_vm0, %v928_v3  ;;  %802 = vmatpush3.bf16.msra.mxu0 %v899_v6  ;;  %v759_v10 = vld [vmem:[%s1270_s2] ss:$0 sm:$0xff]  ;;  %v88_v12 = vadd.f32 %v760_v8, %v70_v9  ;;  %v71_v14 = vld [vmem:[%s1271_s0 + $0x18] sm:$0xff] }
   0x6   :  { %58 = vst.msk [vmem:[#allocation3 + $0x10] sm:$0xff] %vm47_vm0, %v928_v3  ;;  %59 = vst.msk [vmem:[#allocation3 + $0x18] sm:$0xff] %vm47_vm0, %v928_v3  ;;  %107 = vperm.xlu1 %838, %v1032_v4   ;;  %97 = vperm.xlu0 %837, %v1037_v5   ;;  %v68_v11 = vld [vmem:[%s1271_s0] sm:$0xff]  ;;  %v69_v15 = vld [vmem:[%s1271_s0 + $0x8] sm:$0xff]  ;;  %v89_v20 = vadd.f32 %v760_v8, %v71_v14 }
   0x7   :  { %60 = vst.msk [vmem:[#allocation3 + $0x20] sm:$0xff] %vm47_vm0, %v928_v3  ;;  %61 = vst.msk [vmem:[#allocation3 + $0x28] sm:$0xff] %vm47_vm0, %v928_v3  ;;  %803 = vmatprep.subr.bf16.mxu0 %v900_v7  ;;  %v86_v13 = vadd.f32 %v759_v10, %v68_v11  ;;  %v87_v21 = vadd.f32 %v759_v10, %v69_v15  ;;  %v901_v26 = vld [vmem:[%s1269_s3 + $0x10] sm:$0xff]   ;;  %v902_v29 = vld [vmem:[%s1269_s3 + $0x18] sm:$0xff]  }
   0x8   :  { %62 = vst.msk [vmem:[#allocation3 + $0x30] sm:$0xff] %vm47_vm0, %v928_v3  ;;  %63 = vst.msk [vmem:[#allocation3 + $0x38] sm:$0xff] %vm47_vm0, %v928_v3  ;;  %v903_v40 = vld [vmem:[%s1269_s3 + $0x20] sm:$0xff]   ;;  %v904_v48 = vld [vmem:[%s1269_s3 + $0x28] sm:$0xff]  }
   0x9   :  { %804 = vmatpush3.bf16.msra.mxu0 %v900_v7  ;;  %v118_v62 = vld [vmem:[#allocation2] sm:$0xff] }
   0xa   :  { %805 = vmatprep.subr.bf16.mxu0 %v901_v26  ;;  %v121_v39 = vld [vmem:[#allocation2 + $0x18] sm:$0xff]  ;;  %v122_v9 = vld [vmem:[#allocation2 + $0x20] sm:$0xff] }
   0xb   :  { %v125_v33 = vld [vmem:[#allocation2 + $0x38] sm:$0xff]  ;;  %v161_v50 = vrot.slane %v121_v39, 2 }
   0xc   :  { %v166_v43 = vrot.slane %v125_v33, 2 }
   0xd   :  { %806 = vmatpush3.bf16.msra.mxu0 %v901_v26 }
   0xe   :  { %807 = vmatprep.subr.bf16.mxu0 %v902_v29 }
  0x11   :  { %808 = vmatpush3.bf16.msra.mxu0 %v902_v29 }
  0x12   :  { %809 = vmatprep.subr.bf16.mxu0 %v903_v40 }
  0x15   :  { %810 = vmatpush3.bf16.msra.mxu0 %v903_v40 }
  0x16   :  { %811 = vmatprep.subr.bf16.mxu0 %v904_v48 }
  0x19   :  { %812 = vmatpush3.bf16.msra.mxu0 %v904_v48 }
  0x81   :  { %v1065_v16 = vpop.permute.xlu1 %102  ;;  %v1067_v17 = vpop.permute.xlu0 %92 }
  0x82   :  { %v112_v18 = vmul.f32 %v1065_v16, %v88_v12  ;;  %v110_v19 = vmul.f32 %v1067_v17, %v86_v13 }
  0x84   :  { %116 = vst.msk [vmem:[#allocation2 + $0x28] sm:$0xff] %vm47_vm0, %v112_v18  ;;  %114 = vst.msk [vmem:[#allocation2 + $0x8] sm:$0xff] %vm47_vm0, %v110_v19 }
  0x85   :  { %v1073_v22 = vpop.permute.xlu1 %107  ;;  %v1075_v23 = vpop.permute.xlu0 %97 }
  0x86   :  { %v113_v24 = vmul.f32 %v1073_v22, %v89_v20  ;;  %v111_v25 = vmul.f32 %v1075_v23, %v87_v21 }
  0x88   :  { %117 = vst.msk [vmem:[#allocation2 + $0x30] sm:$0xff] %vm47_vm0, %v113_v24  ;;  %115 = vst.msk [vmem:[#allocation2 + $0x10] sm:$0xff] %vm47_vm0, %v111_v25 }
  0x8b   :  { %v1084_v27 = vld [vmem:[#allocation2 + $0x28] sm:$0xff] }
  0x8c   :  { %v119_v28 = vld [vmem:[#allocation2 + $0x8] sm:$0xff]  ;;  %v134_v30 = vrot.slane %v1084_v27, 1  ;;  %v163_v46 = vrot.slane %v1084_v27, 2 }
  0x8d   :  { %v131_v35 = vrot.slane %v119_v28, 1  ;;  %v158_v38 = vrot.slane %v119_v28, 2 }
  0x8f   :  { %v1090_v31 = vld [vmem:[#allocation2 + $0x10] sm:$0xff] }
  0x90   :  { %v1092_v32 = vld [vmem:[#allocation2 + $0x30] sm:$0xff]  ;;  %v132_v34 = vrot.slane %v1090_v31, 1  ;;  %v159_v36 = vrot.slane %v1090_v31, 2 }
  0x91   :  { %v135_v37 = vrot.slane %v1092_v32, 1  ;;  %v164_v47 = vrot.slane %v1092_v32, 2 }
  0x92   :  { %v839_v41 = vpack.i.bf16 %v134_v30, %v132_v34  ;;  %v133_v42 = vsel %vm130_vm1, %v131_v35, %v132_v34  ;;  %v160_v45 = vsel %vm157_vm2, %v158_v38, %v159_v36  ;;  %v162_v55 = vsel %vm157_vm2, %v159_v36, %v161_v50 }
  0x93   :  { %v844_v44 = vpack.i.bf16 %v133_v42, %v131_v35  ;;  %v136_v49 = vsel %vm130_vm1, %v134_v30, %v135_v37  ;;  %v854_v51 = vpack.i.bf16 %v160_v45, %v158_v38  ;;  %v165_v53 = vsel %vm157_vm2, %v163_v46, %v164_v47 }
  0x94   :  { %840 = vrot.lane.b32.xlu1 %v839_v41, %s929_s20  ;;  %v849_v52 = vpack.i.bf16 %v135_v37, %v136_v49  ;;  %v167_v54 = vsel %vm157_vm2, %v164_v47, %v166_v43  ;;  %v859_v57 = vpack.i.bf16 %v163_v46, %v162_v55  ;;  %v761_v46 = vld [vmem:[%s1272_s4] ss:$0 sm:$0xff] }
  0x95   :  { %845 = vrot.lane.b32.xlu0 %v844_v44, %s929_s20  ;;  %v864_v56 = vpack.i.bf16 %v167_v54, %v165_v53 }
  0x98   :  { %855 = vrot.lane.b32.xlu1 %v854_v51, %s930_s21 }
  0x99   :  { %850 = vrot.lane.b32.xlu0 %v849_v52, %s929_s20 }
  0x9c   :  { %865 = vrot.lane.b32.xlu1 %v864_v56, %s930_s21 }
  0x9d   :  { %860 = vrot.lane.b32.xlu0 %v859_v57, %s930_s21 }
 0x106   :  { %v841_v58 = vpop.permute.xlu1 %840 }
 0x107   :  { %v846_v59 = vpop.permute.xlu0 %845  ;;  %v843_v0 = vunpack.i.h.bf16 %v841_v58  ;;  %v842_v3 = vunpack.i.l.bf16 %v841_v58 }
 0x108   :  { %v848_v60 = vunpack.i.h.bf16 %v846_v59  ;;  %v847_v61 = vunpack.i.l.bf16 %v846_v59 }
 0x109   :  { %v189_v19 = vsel %vm47_vm0, %v122_v9, %v843_v0  ;;  %v188_v20 = vsel %vm47_vm0, %v1090_v31, %v842_v3 }
 0x10a   :  { %v856_v63 = vpop.permute.xlu1 %855  ;;  %v187_v12 = vsel %vm47_vm0, %v119_v28, %v848_v60  ;;  %v186_v13 = vsel %vm47_vm0, %v118_v62, %v847_v61 }
 0x10b   :  { %v858_v6 = vunpack.i.h.bf16 %v856_v63  ;;  %v857_v7 = vunpack.i.l.bf16 %v856_v63  ;;  %v851_v8 = vpop.permute.xlu0 %850 }
 0x10c   :  { %v853_v10 = vunpack.i.h.bf16 %v851_v8  ;;  %v852_v11 = vunpack.i.l.bf16 %v851_v8 }
 0x10d   :  { %v193_v14 = vsel %vm192_vm3, %v186_v13, %v857_v7  ;;  %v194_v15 = vsel %vm192_vm3, %v187_v12, %v858_v6 }
 0x10e   :  { %v866_v18 = vpop.permute.xlu1 %865  ;;  %v191_v26 = vsel %vm47_vm0, %v1092_v32, %v853_v10  ;;  %v190_v28 = vsel %vm47_vm0, %v1084_v27, %v852_v11  ;;  %v206_v33 = vrot.slane %v193_v14, 7  ;;  %v207_v34 = vrot.slane %v194_v15, 7 }
 0x10f   :  { %v868_v21 = vunpack.i.h.bf16 %v866_v18  ;;  %v867_v24 = vunpack.i.l.bf16 %v866_v18  ;;  %v861_v25 = vpop.permute.xlu0 %860 }
 0x110   :  { %v863_v29 = vunpack.i.h.bf16 %v861_v25  ;;  %v862_v30 = vunpack.i.l.bf16 %v861_v25  ;;  %v208_v27 = vsel %vm205_vm4, %v206_v33, %v207_v34 }
 0x111   :  { %v197_v35 = vsel %vm192_vm3, %v190_v28, %v867_v24  ;;  %v198_v36 = vsel %vm192_vm3, %v191_v26, %v868_v21 }
 0x112   :  { %v212_v37 = vrot.slane %v197_v35, 7  ;;  %v214_v38 = vrot.slane %v198_v36, 7  ;;  %v196_v31 = vsel %vm192_vm3, %v189_v19, %v863_v29  ;;  %v195_v39 = vsel %vm192_vm3, %v188_v20, %v862_v30 }
 0x113   :  { %v211_v40 = vrot.slane %v196_v31, 7  ;;  %v209_v41 = vrot.slane %v195_v39, 7 }
 0x114   :  { %v215_v32 = vsel %vm205_vm4, %v212_v37, %v214_v38 }
 0x115   :  { %v210_v42 = vsel %vm205_vm4, %v207_v34, %v209_v41  ;;  %v213_v43 = vsel %vm205_vm4, %v211_v40, %v212_v37 }
 0x116   :  { %v220_v44 = vpack.c.bf16 %v210_v42, %v208_v27  ;;  %v221_v45 = vpack.c.bf16 %v215_v32, %v213_v43  ;;  %v770_v32 = vld [vmem:[%s1273_s5] ss:$0 sm:$0xff] }
 0x117   :  { %v771_v43 = vld [vmem:[%s1274_s6] ss:$0 sm:$0xff] }
 0x118   :  { %813 = vmatprep.mubr.msk.bf16.mxu0 %vm277_vm5, %v220_v44 }
 0x119   :  { %814 = vmatmul.mubr.msk.bf16.vlgmr.msra.gmra.mrb[0].mxu0 %vm277_vm5, %v221_v45 }
 0x1ec   :  { %v815_v47 = vpop.f32.mrb[0].mxu0 }
 0x1ed   :  { %v318_v48 = vpop.f32.mrb[1].mxu0  ;;  %v327_v49 = vadd.f32 %v815_v47, %v761_v46 }
 0x1ee   :  { %v319_v50 = vadd.f32 %v761_v46, %v318_v48  ;;  %v816_v51 = vpop.f32.mrb[2].mxu0 }
 0x1ef   :  { %v321_v52 = vpop.f32.mrb[3].mxu0  ;;  %v335_v55 = vmax.f32 %v327_v49, 0.0  ;;  %v330_v56 = vadd.f32 %v816_v51, %v761_v46 }
 0x1f0   :  { %v333_v53 = vmax.f32 %v319_v50, 0.0  ;;  %v322_v54 = vadd.f32 %v761_v46, %v321_v52 }
 0x1f1   :  { %v336_v60 = vmax.f32 %v330_v56, 0.0  ;;  %v343_v61 = vsel %vm47_vm0, %v335_v55, 0.0 }
 0x1f2   :  { %v334_v57 = vmax.f32 %v322_v54, 0.0  ;;  %v337_v58 = vsel %vm47_vm0, %v333_v53, 0.0 }
 0x1f3   :  { %338 = vadd.xlane.f32.xlu0 %v337_v58  ;;  %v346_v62 = vsel %vm47_vm0, %v336_v60, 0.0 }
 0x1f4   :  { %v340_v59 = vsel %vm47_vm0, %v334_v57, 0.0 }
 0x1f5   :  { %341 = vadd.xlane.f32.xlu1 %v340_v59 }
 0x1f7   :  { %344 = vadd.xlane.f32.xlu0 %v343_v61 }
 0x1fb   :  { %347 = vadd.xlane.f32.xlu0 %v346_v62  ;;  %v423_v62 = vld [vmem:[#allocation3 + $0x18] sm:$0xff] }
 0x280   :  { %v339_v63 = vpop.xlane.xlu0 %338 }
 0x281   :  { %v350_v0 = vmul.f32 0.03125, %v339_v63  ;;  %v906_v63 = vld [vmem:[%s1275_s7 + $0x8] sm:$0xff]  }
 0x282   :  { %v342_v3 = vpop.xlane.xlu1 %341 }
 0x283   :  { %v354_v6 = vsub.f32 %v333_v53, %v350_v0  ;;  %v351_v7 = vmul.f32 0.03125, %v342_v3 }
 0x284   :  { %v345_v8 = vpop.xlane.xlu0 %344 }
 0x285   :  { %v355_v9 = vsub.f32 %v334_v57, %v351_v7  ;;  %v352_v10 = vmul.f32 0.03125, %v345_v8  ;;  %v358_v11 = vmul.f32 %v354_v6, %v354_v6  ;;  %v461_v7 = vrot.slane %v423_v62, 2 }
 0x287   :  { %v356_v12 = vsub.f32 %v335_v55, %v352_v10  ;;  %v362_v13 = vsel %vm47_vm0, %v358_v11, 0.0  ;;  %v359_v14 = vmul.f32 %v355_v9, %v355_v9  ;;  %v907_v10 = vld [vmem:[%s1275_s7 + $0x10] sm:$0xff]  }
 0x288   :  { %363 = vadd.xlane.f32.xlu1 %v362_v13  ;;  %v348_v15 = vpop.xlane.xlu0 %347 }
 0x289   :  { %v353_v18 = vmul.f32 0.03125, %v348_v15  ;;  %v365_v19 = vsel %vm47_vm0, %v359_v14, 0.0  ;;  %v360_v20 = vmul.f32 %v356_v12, %v356_v12 }
 0x28a   :  { %366 = vadd.xlane.f32.xlu0 %v365_v19  ;;  %v908_v19 = vld [vmem:[%s1275_s7 + $0x18] sm:$0xff]  }
 0x28b   :  { %v357_v21 = vsub.f32 %v336_v60, %v353_v18  ;;  %v368_v24 = vsel %vm47_vm0, %v360_v20, 0.0  ;;  %v905_v60 = vld [vmem:[%s1275_s7] sm:$0xff]  }
 0x28c   :  { %369 = vadd.xlane.f32.xlu1 %v368_v24  ;;  %817 = vmatprep.subr.bf16.mxu1 %v905_v60 }
 0x28d   :  { %v361_v25 = vmul.f32 %v357_v21, %v357_v21  ;;  %818 = vmatpush3.bf16.msra.mxu1 %v905_v60 }
 0x28e   :  { %819 = vmatprep.subr.bf16.mxu1 %v906_v63 }
 0x28f   :  { %v371_v26 = vsel %vm47_vm0, %v361_v25, 0.0 }
 0x290   :  { %372 = vadd.xlane.f32.xlu0 %v371_v26 }
 0x291   :  { %820 = vmatpush3.bf16.msra.mxu1 %v906_v63 }
 0x292   :  { %821 = vmatprep.subr.bf16.mxu1 %v907_v10 }
 0x295   :  { %822 = vmatpush3.bf16.msra.mxu1 %v907_v10 }
 0x296   :  { %823 = vmatprep.subr.bf16.mxu1 %v908_v19 }
 0x299   :  { %824 = vmatpush3.bf16.msra.mxu1 %v908_v19 }
 0x315   :  { %v364_v28 = vpop.xlane.xlu1 %363 }
 0x316   :  { %v374_v29 = vmul.f32 0.03125, %v364_v28  ;;  %v909_v28 = vld [vmem:[%s1275_s7 + $0x20] sm:$0xff]  }
 0x317   :  { %v367_v30 = vpop.xlane.xlu0 %366  ;;  %825 = vmatprep.subr.bf16.mxu1 %v909_v28 }
 0x318   :  { %v378_v33 = vadd.f32 1e-05, %v374_v29  ;;  %v375_v34 = vmul.f32 0.03125, %v367_v30  ;;  %v427_v29 = vld [vmem:[#allocation3 + $0x38] sm:$0xff]  ;;  %826 = vmatpush3.bf16.msra.mxu1 %v909_v28 }
 0x319   :  { %v370_v35 = vpop.xlane.xlu1 %369 }
 0x31a   :  { %911 = vrsqrt.f32 %v378_v33  ;;  %v379_v36 = vadd.f32 1e-05, %v375_v34  ;;  %v376_v37 = vmul.f32 0.03125, %v370_v35  ;;  %v910_v34 = vld [vmem:[%s1275_s7 + $0x28] sm:$0xff]  }
 0x31b   :  { %827 = vmatprep.subr.bf16.mxu1 %v910_v34 }
 0x31c   :  { %913 = vrsqrt.f32 %v379_v36  ;;  %v380_v38 = vadd.f32 1e-05, %v376_v37  ;;  %v466_v37 = vrot.slane %v427_v29, 2  ;;  %828 = vmatpush3.bf16.msra.mxu1 %v910_v34 }
 0x31d   :  { %v373_v31 = vpop.xlane.xlu0 %372 }
 0x31e   :  { %915 = vrsqrt.f32 %v380_v38  ;;  %v377_v39 = vmul.f32 0.03125, %v373_v31 }
 0x320   :  { %v381_v40 = vadd.f32 1e-05, %v377_v39 }
 0x322   :  { %917 = vrsqrt.f32 %v381_v40 }
 0x324   :  { %v912_v41 = vpop.eup %911 }
 0x325   :  { %v386_v27 = vmul.f32 %v912_v41, %v354_v6 }
 0x326   :  { %v914_v42 = vpop.eup %913 }
 0x327   :  { %v397_v44 = vmul.f32 %v770_v32, %v386_v27  ;;  %v387_v45 = vmul.f32 %v914_v42, %v355_v9 }
 0x328   :  { %v916_v46 = vpop.eup %915 }
 0x329   :  { %v408_v47 = vadd.f32 %v771_v43, %v397_v44  ;;  %v398_v48 = vmul.f32 %v770_v32, %v387_v45  ;;  %v388_v49 = vmul.f32 %v916_v46, %v356_v12 }
 0x32b   :  { %v412_v50 = vmul.f32 %v408_v47, %v1067_v17  ;;  %v409_v51 = vadd.f32 %v771_v43, %v398_v48  ;;  %v399_v52 = vmul.f32 %v770_v32, %v388_v49  ;;  %v420_v47 = vld [vmem:[#allocation3] sm:$0xff] }
 0x32c   :  { %v918_v53 = vpop.eup %917 }
 0x32d   :  { %416 = vst.msk [vmem:[#allocation3 + $0x8] sm:$0xff] %vm47_vm0, %v412_v50  ;;  %v413_v54 = vmul.f32 %v409_v51, %v1075_v23  ;;  %v410_v55 = vadd.f32 %v771_v43, %v399_v52  ;;  %v389_v56 = vmul.f32 %v918_v53, %v357_v21  ;;  %v424_v51 = vld [vmem:[#allocation3 + $0x20] sm:$0xff] }
 0x32f   :  { %417 = vst.msk [vmem:[#allocation3 + $0x10] sm:$0xff] %vm47_vm0, %v413_v54  ;;  %v414_v57 = vmul.f32 %v410_v55, %v1065_v16  ;;  %v400_v58 = vmul.f32 %v770_v32, %v389_v56 }
 0x331   :  { %418 = vst.msk [vmem:[#allocation3 + $0x28] sm:$0xff] %vm47_vm0, %v414_v57  ;;  %v411_v59 = vadd.f32 %v771_v43, %v400_v58 }
 0x333   :  { %v415_v61 = vmul.f32 %v411_v59, %v1073_v22 }
 0x334   :  { %v421_v15 = vld [vmem:[#allocation3 + $0x8] sm:$0xff] }
 0x335   :  { %419 = vst.msk [vmem:[#allocation3 + $0x30] sm:$0xff] %vm47_vm0, %v415_v61  ;;  %v432_v24 = vrot.slane %v421_v15, 1  ;;  %v458_v30 = vrot.slane %v421_v15, 2 }
 0x336   :  { %v422_v0 = vld [vmem:[#allocation3 + $0x10] sm:$0xff] }
 0x337   :  { %v459_v6 = vrot.slane %v422_v0, 2  ;;  %v433_v8 = vrot.slane %v422_v0, 1 }
 0x338   :  { %v1169_v3 = vld [vmem:[#allocation3 + $0x28] sm:$0xff] }
 0x339   :  { %v435_v9 = vrot.slane %v1169_v3, 1  ;;  %v463_v12 = vrot.slane %v1169_v3, 2  ;;  %v462_v13 = vsel %vm157_vm2, %v459_v6, %v461_v7  ;;  %v434_v26 = vsel %vm130_vm1, %v432_v24, %v433_v8 }
 0x33a   :  { %v879_v33 = vpack.i.bf16 %v434_v26, %v432_v24  ;;  %v460_v35 = vsel %vm157_vm2, %v458_v30, %v459_v6 }
 0x33b   :  { %v869_v11 = vpack.i.bf16 %v435_v9, %v433_v8  ;;  %v889_v20 = vpack.i.bf16 %v463_v12, %v462_v13  ;;  %v884_v38 = vpack.i.bf16 %v460_v35, %v458_v30 }
 0x33c   :  { %v1177_v14 = vld [vmem:[#allocation3 + $0x30] sm:$0xff] }
 0x33d   :  { %870 = vrot.lane.b32.xlu0 %v869_v11, %s929_s20  ;;  %v436_v18 = vrot.slane %v1177_v14, 1  ;;  %v464_v36 = vrot.slane %v1177_v14, 2 }
 0x33f   :  { %v437_v21 = vsel %vm130_vm1, %v435_v9, %v436_v18  ;;  %v465_v31 = vsel %vm157_vm2, %v463_v12, %v464_v36  ;;  %v467_v39 = vsel %vm157_vm2, %v464_v36, %v466_v37 }
 0x340   :  { %v874_v25 = vpack.i.bf16 %v436_v18, %v437_v21  ;;  %v894_v40 = vpack.i.bf16 %v467_v39, %v465_v31 }
 0x341   :  { %890 = vrot.lane.b32.xlu0 %v889_v20, %s930_s21 }
 0x342   :  { %875 = vrot.lane.b32.xlu1 %v874_v25, %s929_s20 }
 0x346   :  { %880 = vrot.lane.b32.xlu1 %v879_v33, %s929_s20 }
 0x34a   :  { %885 = vrot.lane.b32.xlu1 %v884_v38, %s930_s21 }
 0x34e   :  { %895 = vrot.lane.b32.xlu1 %v894_v40, %s930_s21 }
 0x3af   :  { %v871_v41 = vpop.permute.xlu0 %870 }
 0x3b0   :  { %v872_v42 = vunpack.i.l.bf16 %v871_v41  ;;  %v873_v48 = vunpack.i.h.bf16 %v871_v41 }
 0x3b2   :  { %v488_v49 = vsel %vm47_vm0, %v422_v0, %v872_v42  ;;  %v489_v62 = vsel %vm47_vm0, %v424_v51, %v873_v48 }
 0x3b3   :  { %v891_v27 = vpop.permute.xlu0 %890 }
 0x3b4   :  { %v876_v32 = vpop.permute.xlu1 %875  ;;  %v892_v44 = vunpack.i.l.bf16 %v891_v27  ;;  %v893_v52 = vunpack.i.h.bf16 %v891_v27 }
 0x3b5   :  { %v878_v56 = vunpack.i.h.bf16 %v876_v32  ;;  %v877_v57 = vunpack.i.l.bf16 %v876_v32 }
 0x3b6   :  { %v494_v53 = vsel %vm192_vm3, %v488_v49, %v892_v44  ;;  %v495_v8 = vsel %vm192_vm3, %v489_v62, %v893_v52 }
 0x3b7   :  { %v507_v63 = vrot.slane %v494_v53, 7  ;;  %v491_v11 = vsel %vm47_vm0, %v1177_v14, %v878_v56  ;;  %v490_v12 = vsel %vm47_vm0, %v1169_v3, %v877_v57  ;;  %v509_v21 = vrot.slane %v495_v8, 7  ;;  %v772_v3 = vld [vmem:[%s1276_s8] ss:$0 sm:$0xff] }
 0x3b8   :  { %v881_v43 = vpop.permute.xlu1 %880 }
 0x3b9   :  { %v883_v45 = vunpack.i.h.bf16 %v881_v43  ;;  %v882_v46 = vunpack.i.l.bf16 %v881_v43 }
 0x3bb   :  { %v487_v58 = vsel %vm47_vm0, %v421_v15, %v883_v45  ;;  %v486_v59 = vsel %vm47_vm0, %v420_v47, %v882_v46 }
 0x3bc   :  { %v886_v50 = vpop.permute.xlu1 %885 }
 0x3bd   :  { %v888_v54 = vunpack.i.h.bf16 %v886_v50  ;;  %v887_v55 = vunpack.i.l.bf16 %v886_v50 }
 0x3bf   :  { %v492_v60 = vsel %vm192_vm3, %v486_v59, %v887_v55  ;;  %v493_v61 = vsel %vm192_vm3, %v487_v58, %v888_v54 }
 0x3c0   :  { %v504_v0 = vrot.slane %v492_v60, 7  ;;  %v505_v6 = vrot.slane %v493_v61, 7  ;;  %v896_v7 = vpop.permute.xlu1 %895 }
 0x3c1   :  { %v898_v9 = vunpack.i.h.bf16 %v896_v7  ;;  %v897_v10 = vunpack.i.l.bf16 %v896_v7 }
 0x3c2   :  { %v506_v13 = vsel %vm205_vm4, %v504_v0, %v505_v6  ;;  %v508_v15 = vsel %vm205_vm4, %v505_v6, %v507_v63  ;;  %v18_v0 = vstv %s1277_s12 }
 0x3c3   :  { %v496_v18 = vsel %vm192_vm3, %v490_v12, %v897_v10  ;;  %v497_v19 = vsel %vm192_vm3, %v491_v11, %v898_v9  ;;  %v518_v20 = vpack.c.bf16 %v508_v15, %v506_v13  ;;  %19 = vst [vmem:[#allocation4] sm:$0x1] %v18_v0 }
 0x3c4   :  { %v510_v24 = vrot.slane %v496_v18, 7  ;;  %v512_v25 = vrot.slane %v497_v19, 7 }
 0x3c5   :  { %829 = vmatprep.mubr.msk.bf16.mxu1 %vm277_vm5, %v518_v20 }
 0x3c6   :  { %v511_v26 = vsel %vm205_vm4, %v509_v21, %v510_v24  ;;  %v513_v14 = vsel %vm205_vm4, %v510_v24, %v512_v25  ;;  %v781_v24 = vld [vmem:[%s1278_s9] ss:$0 sm:$0xff] }
 0x3c7   :  { %v519_v28 = vpack.c.bf16 %v513_v14, %v511_v26  ;;  %v782_v14 = vld [vmem:[%s1279_s10] ss:$0 sm:$0xff] }
 0x3c9   :  { %830 = vmatmul.mubr.msk.bf16.vlgmr.msra.gmra.mrb[0].mxu1 %vm277_vm5, %v519_v28 }
 0x49c   :  { %v831_v29 = vpop.f32.mrb[0].mxu1 }
 0x49d   :  { %v615_v30 = vpop.f32.mrb[1].mxu1  ;;  %v624_v33 = vadd.f32 %v831_v29, %v772_v3 }
 0x49e   :  { %v616_v34 = vadd.f32 %v772_v3, %v615_v30  ;;  %v832_v35 = vpop.f32.mrb[2].mxu1 }
 0x49f   :  { %v618_v36 = vpop.f32.mrb[3].mxu1  ;;  %v632_v31 = vmax.f32 %v624_v33, 0.0  ;;  %v627_v39 = vadd.f32 %v832_v35, %v772_v3  ;;  %v783_v35 = vld [vmem:[%s1280_s11] ss:$0 sm:$0xff] }
 0x4a0   :  { %v630_v37 = vmax.f32 %v616_v34, 0.0  ;;  %v619_v38 = vadd.f32 %v772_v3, %v618_v36 }
 0x4a1   :  { %v633_v27 = vmax.f32 %v627_v39, 0.0  ;;  %v640_v42 = vsel %vm47_vm0, %v632_v31, 0.0 }
 0x4a2   :  { %v631_v40 = vmax.f32 %v619_v38, 0.0  ;;  %v634_v41 = vsel %vm47_vm0, %v630_v37, 0.0 }
 0x4a3   :  { %635 = vadd.xlane.f32.xlu0 %v634_v41  ;;  %v643_v43 = vsel %vm47_vm0, %v633_v27, 0.0 }
 0x4a4   :  { %v637_v32 = vsel %vm47_vm0, %v631_v40, 0.0 }
 0x4a5   :  { %638 = vadd.xlane.f32.xlu1 %v637_v32 }
 0x4a7   :  { %641 = vadd.xlane.f32.xlu0 %v640_v42 }
 0x4ab   :  { %644 = vadd.xlane.f32.xlu0 %v643_v43 }
 0x530   :  { %v636_v44 = vpop.xlane.xlu0 %635 }
 0x531   :  { %v646_v45 = vmul.f32 0.03125, %v636_v44 }
 0x532   :  { %v639_v46 = vpop.xlane.xlu1 %638 }
 0x533   :  { %v650_v47 = vsub.f32 %v630_v37, %v646_v45  ;;  %v647_v48 = vmul.f32 0.03125, %v639_v46 }
 0x534   :  { %v642_v49 = vpop.xlane.xlu0 %641 }
 0x535   :  { %v651_v50 = vsub.f32 %v631_v40, %v647_v48  ;;  %v648_v51 = vmul.f32 0.03125, %v642_v49  ;;  %v654_v52 = vmul.f32 %v650_v47, %v650_v47 }
 0x537   :  { %v652_v53 = vsub.f32 %v632_v31, %v648_v51  ;;  %v658_v54 = vsel %vm47_vm0, %v654_v52, 0.0  ;;  %v655_v55 = vmul.f32 %v651_v50, %v651_v50 }
 0x538   :  { %659 = vadd.xlane.f32.xlu1 %v658_v54  ;;  %v645_v56 = vpop.xlane.xlu0 %644 }
 0x539   :  { %v649_v57 = vmul.f32 0.03125, %v645_v56  ;;  %v661_v58 = vsel %vm47_vm0, %v655_v55, 0.0  ;;  %v656_v59 = vmul.f32 %v652_v53, %v652_v53 }
 0x53a   :  { %662 = vadd.xlane.f32.xlu0 %v661_v58 }
 0x53b   :  { %v653_v60 = vsub.f32 %v633_v27, %v649_v57  ;;  %v664_v61 = vsel %vm47_vm0, %v656_v59, 0.0 }
 0x53c   :  { %665 = vadd.xlane.f32.xlu1 %v664_v61 }
 0x53d   :  { %v657_v62 = vmul.f32 %v653_v60, %v653_v60 }
 0x53f   :  { %v667_v63 = vsel %vm47_vm0, %v657_v62, 0.0 }
 0x540   :  { %668 = vadd.xlane.f32.xlu0 %v667_v63 }
 0x5c5   :  { %v660_v6 = vpop.xlane.xlu1 %659 }
 0x5c6   :  { %v670_v7 = vmul.f32 0.03125, %v660_v6 }
 0x5c7   :  { %v663_v8 = vpop.xlane.xlu0 %662 }
 0x5c8   :  { %v674_v9 = vadd.f32 1e-05, %v670_v7  ;;  %v671_v10 = vmul.f32 0.03125, %v663_v8 }
 0x5c9   :  { %v666_v11 = vpop.xlane.xlu1 %665 }
 0x5ca   :  { %919 = vrsqrt.f32 %v674_v9  ;;  %v675_v12 = vadd.f32 1e-05, %v671_v10  ;;  %v672_v13 = vmul.f32 0.03125, %v666_v11 }
 0x5cc   :  { %921 = vrsqrt.f32 %v675_v12  ;;  %v676_v15 = vadd.f32 1e-05, %v672_v13 }
 0x5cd   :  { %v669_v18 = vpop.xlane.xlu0 %668 }
 0x5ce   :  { %923 = vrsqrt.f32 %v676_v15  ;;  %v673_v19 = vmul.f32 0.03125, %v669_v18 }
 0x5d0   :  { %v677_v20 = vadd.f32 1e-05, %v673_v19 }
 0x5d2   :  { %925 = vrsqrt.f32 %v677_v20 }
 0x5d4   :  { %v920_v21 = vpop.eup %919 }
 0x5d5   :  { %v682_v25 = vmul.f32 %v920_v21, %v650_v47 }
 0x5d6   :  { %v922_v26 = vpop.eup %921 }
 0x5d7   :  { %v693_v28 = vmul.f32 %v781_v24, %v682_v25  ;;  %v683_v3 = vmul.f32 %v922_v26, %v651_v50  ;;  %v784_v50 = vld [vmem:[#allocation4] ss:$0 sm:$0xff] }
 0x5d8   :  { %v924_v29 = vpop.eup %923 }
 0x5d9   :  { %v704_v30 = vadd.f32 %v782_v14, %v693_v28  ;;  %v694_v33 = vmul.f32 %v781_v24, %v683_v3  ;;  %v684_v34 = vmul.f32 %v924_v29, %v652_v53 }
 0x5db   :  { %v709_v36 = vmul.f32 %v704_v30, %v1067_v17  ;;  %v705_v37 = vadd.f32 %v782_v14, %v694_v33  ;;  %v695_v38 = vmul.f32 %v781_v24, %v684_v34 }
 0x5dc   :  { %v926_v31 = vpop.eup %925 }
 0x5dd   :  { %v719_v39 = vmul.f32 %v783_v35, %v709_v36  ;;  %v710_v40 = vmul.f32 %v705_v37, %v1075_v23  ;;  %v706_v41 = vadd.f32 %v782_v14, %v695_v38  ;;  %v685_v32 = vmul.f32 %v926_v31, %v653_v60 }
 0x5df   :  { %v723_v27 = vsel %vm47_vm0, %v719_v39, 0.0  ;;  %v720_v42 = vmul.f32 %v783_v35, %v710_v40  ;;  %v711_v43 = vmul.f32 %v706_v41, %v1065_v16  ;;  %v696_v44 = vmul.f32 %v781_v24, %v685_v32 }
 0x5e0   :  { %724 = vadd.xlane.f32.xlu1 %v723_v27 }
 0x5e1   :  { %v726_v45 = vsel %vm47_vm0, %v720_v42, 0.0  ;;  %v721_v46 = vmul.f32 %v783_v35, %v711_v43  ;;  %v707_v47 = vadd.f32 %v782_v14, %v696_v44 }
 0x5e2   :  { %727 = vadd.xlane.f32.xlu0 %v726_v45 }
 0x5e3   :  { %v729_v17 = vsel %vm47_vm0, %v721_v46, 0.0  ;;  %v712_v48 = vmul.f32 %v707_v47, %v1073_v22 }
 0x5e4   :  { %730 = vadd.xlane.f32.xlu1 %v729_v17 }
 0x5e5   :  { %v722_v23 = vmul.f32 %v783_v35, %v712_v48 }
 0x5e7   :  { %v732_v49 = vsel %vm47_vm0, %v722_v23, 0.0 }
 0x5e8   :  { %733 = vadd.xlane.f32.xlu0 %v732_v49 }
 0x66d   :  { %v725_v51 = vpop.xlane.xlu1 %724 }
 0x66e   :  { %v742_v52 = vadd.f32 %v784_v50, %v725_v51 }
 0x66f   :  { %v728_v16 = vpop.xlane.xlu0 %727 }
 0x670   :  { %v746_v53 = vmul.f32 %v742_v52, %v1009_v2  ;;  %v743_v54 = vadd.f32 %v784_v50, %v728_v16 }
 0x671   :  { %v731_v55 = vpop.xlane.xlu1 %730 }
 0x672   :  { %751 = vst.msk [vmem:[%s1281_s13] sm:$0xff] %vm750_vm6, %v746_v53  ;;  %v747_v22 = vmul.f32 %v743_v54, %v1037_v5  ;;  %v744_v56 = vadd.f32 %v784_v50, %v731_v55 }
 0x674   :  { %752 = vst.msk [vmem:[%s1281_s13 + $0x8] sm:$0xff] %vm750_vm6, %v747_v22  ;;  %v748_v57 = vmul.f32 %v744_v56, %v1004_v1 }
 0x675   :  { %v734_v58 = vpop.xlane.xlu0 %733 }
 0x676   :  { %753 = vst.msk [vmem:[%s1281_s13 + $0x10] sm:$0xff] %vm750_vm6, %v748_v57  ;;  %v745_v2 = vadd.f32 %v784_v50, %v734_v58 }
 0x678   :  { %v749_v59 = vmul.f32 %v745_v2, %v1032_v4 }
 0x67a   :  { %754 = vst.msk [vmem:[%s1281_s13 + $0x18] sm:$0xff] %vm750_vm6, %v749_v59 }

</bundles_post_ra>
